<compile_context>
chip_gen: v7x
topology: tpu7x:2x2x1
jax: 0.10.0
libtpu: 0.0.40
codegen_flags: <defaults>
</compile_context>

<pallas_src>
import jax
import jax.numpy as jnp
import numpy as np
from jax.experimental import pallas as pl
from jax.experimental.pallas import tpu as pltpu


# ----------------------------------------------------------------------------
# Fused kernel: whole GCN forward for a tile of Bt graphs.
#   h1 = relu(adj @ (x  @ W1) + b1)          (dropout = identity, inference)
#   h2 = relu(adj @ (h1 @ W2) + b2)
#   mean = masked mean of h2 over the first length[b] nodes
#   out  = mean @ Wl + bl                     (done on the VPU)
# ----------------------------------------------------------------------------
def gcn_fused_kernel(x_ref, adj_ref, len_ref, w1_ref, b1_ref, w2_ref, b2_ref,
                     wl_ref, bl_ref, o_ref):
    Bt, N, Fin = x_ref.shape
    H1 = w1_ref.shape[1]
    H2 = w2_ref.shape[1]

    x = x_ref[...]          # (Bt, N, Fin)
    adj = adj_ref[...]      # (Bt, N, N)

    def aggregate(s):
        # out[b, i, :] = sum_j adj[b, i, j] * s[b, j, :]
        if N <= 16:
            # VPU broadcast-MAC over the (tiny) neighbour axis: keeps the work
            # on the 4 idle VALU slots instead of a <10%-filled MXU push.
            out = adj[:, :, 0:1] * s[:, 0:1, :]
            for j in range(1, N):
                out = out + adj[:, :, j:j + 1] * s[:, j:j + 1, :]
            return out
        return jnp.einsum('bij,bjk->bik', adj, s,
                          preferred_element_type=jnp.float32)

    # ---- GraphConvolution 1 + ReLU -----------------------------------------
    # x @ W1 as one flattened MXU call, then per-graph adjacency aggregation.
    s1 = jnp.dot(x.reshape(Bt * N, Fin), w1_ref[...],
                 preferred_element_type=jnp.float32).reshape(Bt, N, H1)
    h1 = jnp.maximum(aggregate(s1) + b1_ref[...], 0.0)
    # F.dropout: inference mode -> identity.
    # TODO(synk): training-mode dropout (stateful PRNG masking) not implemented.

    # ---- GraphConvolution 2 + ReLU -----------------------------------------
    s2 = jnp.dot(h1.reshape(Bt * N, H1), w2_ref[...],
                 preferred_element_type=jnp.float32).reshape(Bt, N, H2)
    h2 = jnp.maximum(aggregate(s2) + b2_ref[...], 0.0)

    # ---- masked mean pooling over the first length[b] nodes -----------------
    lens = len_ref[...]                                            # (Bt, 1) int32
    node_idx = jax.lax.broadcasted_iota(jnp.int32, (Bt, N, 1), 1)  # (Bt, N, 1)
    mask = (node_idx < lens.reshape(Bt, 1, 1)).astype(jnp.float32)  # (Bt, N, 1)
    summed = jnp.sum(h2 * mask, axis=1)                            # (Bt, H2)
    denom = jnp.maximum(lens, 1).astype(jnp.float32)               # guard length==0
    mean = summed * pl.reciprocal(denom, approx=True)              # (Bt, H2)

    # ---- linear head (H2 -> 1): VPU multiply + lane reduce ------------------
    head = jnp.sum(mean * wl_ref[...], axis=-1, keepdims=True) + bl_ref[...]  # (Bt, 1)
    o_ref[...] = head


# ----------------------------------------------------------------------------
# Tile-size selection: as many graphs per step as the VMEM budget allows.
# ----------------------------------------------------------------------------
def _pick_graphs_per_step(B, N, Fin, H1, H2, max_bt, vmem_budget_bytes):
    Hm = max(Fin, H1, H2)
    # double-buffered x & adj input tiles + a handful of live f32 (Bt,N,H) temps
    per_graph_bytes = 4 * (2 * N * N + 2 * N * Fin + 6 * N * Hm)
    bt = int(vmem_budget_bytes // max(per_graph_bytes, 1))
    bt = max(1, min(bt, max_bt))
    if bt >= B:
        if B >= 16:
            # keep >=2 parallel grid steps so v7x's second TensorCore is used
            half = (B // 2 // 8) * 8
            if half >= 8:
                return half, int(pl.cdiv(B, half))
        return B, 1
    bt = max(8, (bt // 8) * 8)          # sublane-aligned batch blocks
    return bt, int(pl.cdiv(B, bt))


# ----------------------------------------------------------------------------
# Wrapper: single fused pallas_call over batch tiles of Bt graphs.
# ----------------------------------------------------------------------------
def gcn_forward(params, x, adj, length, *, max_graphs_per_step=512,
                vmem_budget_bytes=24 << 20):
    """x: (B,N,Fin), adj: (B,N,N), length: (B,) int -> (B,1) float32."""
    B, N, Fin = x.shape
    H1 = params["w1"].shape[1]
    H2 = params["w2"].shape[1]

    Bt, n_tiles = _pick_graphs_per_step(B, N, Fin, H1, H2,
                                        max_graphs_per_step, vmem_budget_bytes)
    B_pad = n_tiles * Bt

    lens = length.astype(jnp.int32).reshape(B, 1)
    if B_pad != B:
        # pad only the tiny length vector (padded graphs get length=0, so the
        # pooling mask zeroes them); x / adj stay un-padded -- Pallas handles
        # the partial last batch block, and padded rows are sliced off below.
        lens = jnp.pad(lens, ((0, B_pad - B), (0, 0)))

    wl_row = params["wl"].reshape(1, H2)      # (H2,1) -> (1,H2) row for VPU dot
    bl = params["bl"].reshape(1, 1)

    flops = 2 * B * N * (Fin * H1 + N * H1 + H1 * H2 + N * H2) + 2 * B * H2
    bytes_accessed = 4 * (B * N * (Fin + N) + B            # x, adj, length
                          + Fin * H1 + H1 + H1 * H2 + H2   # weights/biases
                          + H2 + 1 + B)                    # head + output
    cost = pl.CostEstimate(flops=flops, transcendentals=B,
                           bytes_accessed=bytes_accessed)

    out = pl.pallas_call(
        gcn_fused_kernel,
        out_shape=jax.ShapeDtypeStruct((B_pad, 1), jnp.float32),
        grid_spec=pltpu.PrefetchScalarGridSpec(
            num_scalar_prefetch=0,
            grid=(n_tiles,),
            in_specs=[
                pl.BlockSpec((Bt, N, Fin), lambda i: (i, 0, 0)),   # x tile
                pl.BlockSpec((Bt, N, N), lambda i: (i, 0, 0)),     # adj tile
                pl.BlockSpec((Bt, 1), lambda i: (i, 0)),           # lengths tile
                pl.BlockSpec((Fin, H1), lambda i: (0, 0)),         # W1
                pl.BlockSpec((1, H1), lambda i: (0, 0)),           # b1
                pl.BlockSpec((H1, H2), lambda i: (0, 0)),          # W2
                pl.BlockSpec((1, H2), lambda i: (0, 0)),           # b2
                pl.BlockSpec((1, H2), lambda i: (0, 0)),           # Wl (row)
                pl.BlockSpec((1, 1), lambda i: (0, 0)),            # bl
            ],
            out_specs=pl.BlockSpec((Bt, 1), lambda i: (i, 0)),
        ),
        compiler_params=pltpu.CompilerParams(
            dimension_semantics=("parallel",),
            vmem_limit_bytes=32 << 20),
        cost_estimate=cost,
    )(x, adj, lens, params["w1"], params["b1"], params["w2"], params["b2"],
      wl_row, bl)

    return out[:B]


# ----------------------------------------------------------------------------
# Parameter init (matches PyTorch reset_parameters / nn.Linear defaults).
# ----------------------------------------------------------------------------
def init_gcn_params(key, nfeat, nhid1, nhid2):
    k1, k2, k3, k4, k5, k6 = jax.random.split(key, 6)
    stdv1 = 1.0 / (nhid1 ** 0.5)
    stdv2 = 1.0 / (nhid2 ** 0.5)
    w1 = jax.random.uniform(k1, (nfeat, nhid1), jnp.float32, -stdv1, stdv1)
    b1 = jax.random.uniform(k2, (1, nhid1), jnp.float32, -stdv1, stdv1)
    w2 = jax.random.uniform(k3, (nhid1, nhid2), jnp.float32, -stdv2, stdv2)
    b2 = jax.random.uniform(k4, (1, nhid2), jnp.float32, -stdv2, stdv2)
    stdvl = 1.0 / (nhid2 ** 0.5)
    wl = jax.random.uniform(k5, (nhid2, 1), jnp.float32, -stdvl, stdvl)
    bl = jax.random.uniform(k6, (1, 1), jnp.float32, -stdvl, stdvl)
    return dict(w1=w1, b1=b1, w2=w2, b2=b2, wl=wl, bl=bl)


# ----------------------------------------------------------------------------
# Pure-JAX reference (for in-script correctness check).
# ----------------------------------------------------------------------------
def gcn_reference(params, x, adj, length):
    def layer(h, w, b):
        s = jnp.einsum('bnf,fk->bnk', h, w)
        return jax.nn.relu(jnp.einsum('bij,bjk->bik', adj, s) + b)

    h1 = layer(x, params["w1"], params["b1"])
    h2 = layer(h1, params["w2"], params["b2"])
    N = x.shape[1]
    mask = (jnp.arange(N)[None, :, None] < length[:, None, None]).astype(jnp.float32)
    mean = jnp.sum(h2 * mask, axis=1) / jnp.maximum(length, 1)[:, None].astype(jnp.float32)
    return mean @ params["wl"] + params["bl"]


def _make_inputs(key, B, N, nfeat):
    kx, kadj, kl = jax.random.split(key, 3)
    x = jax.random.normal(kx, (B, N, nfeat), dtype=jnp.float32)
    a = jax.random.uniform(kadj, (B, N, N), dtype=jnp.float32)
    adj = (a + jnp.transpose(a, (0, 2, 1))) * 0.5   # symmetric dense adjacency
    length = jax.random.randint(kl, (B,), 1, N + 1).astype(jnp.int32)
    return x, adj, length


if __name__ == "__main__":
    nfeat, nhid1, nhid2 = 16, 32, 16
    key = jax.random.PRNGKey(0)
    kp, k1, k2 = jax.random.split(key, 3)
    params = init_gcn_params(kp, nfeat, nhid1, nhid2)

    # --- small case (single exact batch tile) --------------------------------
    B, N = 2, 8
    x, adj, _ = _make_inputs(k1, B, N, nfeat)
    length = jnp.array([6, 8], dtype=jnp.int32)

    out = gcn_forward(params, x, adj, length)     # (B, 1)
    jax.block_until_ready(out)
    ref = gcn_reference(params, x, adj, length)

    assert out.shape == (B, 1) and out.dtype == jnp.float32
    assert bool(jnp.all(jnp.isfinite(out)))
    assert np.allclose(np.asarray(out), np.asarray(ref), rtol=1e-2, atol=1e-2), (out, ref)

    # --- larger batch (exercises multi-tile grid / Bt selection) -------------
    B2 = 32
    x2, adj2, len2 = _make_inputs(k2, B2, N, nfeat)
    out2 = gcn_forward(params, x2, adj2, len2)
    jax.block_until_ready(out2)
    ref2 = gcn_reference(params, x2, adj2, len2)
    assert out2.shape == (B2, 1)
    assert np.allclose(np.asarray(out2), np.asarray(ref2), rtol=1e-2, atol=1e-2)

    print("KERNEL_OK")
</pallas_src>

<mosaic_0001>
module attributes {stable_mosaic.version = 11 : i64} {
  func.func @gcn_fused_kernel(%arg0: i32, %arg1: memref<2x8x16xf32, #tpu.memory_space<vmem>>, %arg2: memref<2x8x8xf32, #tpu.memory_space<vmem>>, %arg3: memref<2x1xi32, #tpu.memory_space<vmem>>, %arg4: memref<16x32xf32, #tpu.memory_space<vmem>>, %arg5: memref<1x32xf32, #tpu.memory_space<vmem>>, %arg6: memref<32x16xf32, #tpu.memory_space<vmem>>, %arg7: memref<1x16xf32, #tpu.memory_space<vmem>>, %arg8: memref<1x16xf32, #tpu.memory_space<vmem>>, %arg9: memref<1x1xf32, #tpu.memory_space<vmem>>, %arg10: memref<2x1xf32, #tpu.memory_space<vmem>>) attributes {dimension_semantics = [#tpu.dimension_semantics<parallel>], iteration_bounds = array<i64: 1>, scalar_prefetch = 0 : i64, scratch_operands = 0 : i64, tpu.core_type = #tpu.core_type<tc>, window_params = [{transform_indices = @transform_0, window_bounds = array<i64: 2, 8, 16>}, {transform_indices = @transform_1, window_bounds = array<i64: 2, 8, 8>}, {transform_indices = @transform_2, window_bounds = array<i64: 2, 1>}, {pipeline_mode = #tpu.pipeline_mode<synchronous>, transform_indices = @transform_3, window_bounds = array<i64: 16, 32>}, {pipeline_mode = #tpu.pipeline_mode<synchronous>, transform_indices = @transform_4, window_bounds = array<i64: 1, 32>}, {pipeline_mode = #tpu.pipeline_mode<synchronous>, transform_indices = @transform_5, window_bounds = array<i64: 32, 16>}, {pipeline_mode = #tpu.pipeline_mode<synchronous>, transform_indices = @transform_6, window_bounds = array<i64: 1, 16>}, {pipeline_mode = #tpu.pipeline_mode<synchronous>, transform_indices = @transform_7, window_bounds = array<i64: 1, 16>}, {pipeline_mode = #tpu.pipeline_mode<synchronous>, transform_indices = @transform_8, window_bounds = array<i64: 1, 1>}, {transform_indices = @transform_9, window_bounds = array<i64: 2, 1>}]} {
    %c0 = arith.constant 0 : index
    %c0_0 = arith.constant 0 : index
    %c0_1 = arith.constant 0 : index
    %0 = vector.load %arg1[%c0, %c0_0, %c0_1] : memref<2x8x16xf32, #tpu.memory_space<vmem>>, vector<2x8x16xf32>
    %c0_2 = arith.constant 0 : index
    %c0_3 = arith.constant 0 : index
    %c0_4 = arith.constant 0 : index
    %1 = vector.load %arg2[%c0_2, %c0_3, %c0_4] : memref<2x8x8xf32, #tpu.memory_space<vmem>>, vector<2x8x8xf32>
    %2 = vector.shape_cast %0 : vector<2x8x16xf32> to vector<16x16xf32>
    %c0_5 = arith.constant 0 : index
    %c0_6 = arith.constant 0 : index
    %3 = vector.load %arg4[%c0_5, %c0_6] : memref<16x32xf32, #tpu.memory_space<vmem>>, vector<16x32xf32>
    %cst = arith.constant dense<0.000000e+00> : vector<16x32xf32>
    %4 = tpu.matmul %2, %3, %cst {dimension_numbers = #tpu.dot_dimension_numbers<[1], [0], [0], [1], [0, 0, 1, 1], [], []>} : vector<16x16xf32>, vector<16x32xf32>, vector<16x32xf32> -> vector<16x32xf32>
    %5 = vector.shape_cast %4 : vector<16x32xf32> to vector<2x8x32xf32>
    %6 = vector.extract_strided_slice %1 {offsets = [0, 0, 0], sizes = [2, 8, 1], strides = [1, 1, 1]} : vector<2x8x8xf32> to vector<2x8x1xf32>
    %7 = vector.extract_strided_slice %5 {offsets = [0, 0, 0], sizes = [2, 1, 32], strides = [1, 1, 1]} : vector<2x8x32xf32> to vector<2x1x32xf32>
    %8 = vector.broadcast %6 : vector<2x8x1xf32> to vector<2x8x32xf32>
    %9 = vector.broadcast %7 : vector<2x1x32xf32> to vector<2x8x32xf32>
    %10 = arith.mulf %8, %9 : vector<2x8x32xf32>
    %11 = vector.extract_strided_slice %1 {offsets = [0, 0, 1], sizes = [2, 8, 1], strides = [1, 1, 1]} : vector<2x8x8xf32> to vector<2x8x1xf32>
    %12 = vector.extract_strided_slice %5 {offsets = [0, 1, 0], sizes = [2, 1, 32], strides = [1, 1, 1]} : vector<2x8x32xf32> to vector<2x1x32xf32>
    %13 = vector.broadcast %11 : vector<2x8x1xf32> to vector<2x8x32xf32>
    %14 = vector.broadcast %12 : vector<2x1x32xf32> to vector<2x8x32xf32>
    %15 = arith.mulf %13, %14 : vector<2x8x32xf32>
    %16 = arith.addf %10, %15 : vector<2x8x32xf32>
    %17 = vector.extract_strided_slice %1 {offsets = [0, 0, 2], sizes = [2, 8, 1], strides = [1, 1, 1]} : vector<2x8x8xf32> to vector<2x8x1xf32>
    %18 = vector.extract_strided_slice %5 {offsets = [0, 2, 0], sizes = [2, 1, 32], strides = [1, 1, 1]} : vector<2x8x32xf32> to vector<2x1x32xf32>
    %19 = vector.broadcast %17 : vector<2x8x1xf32> to vector<2x8x32xf32>
    %20 = vector.broadcast %18 : vector<2x1x32xf32> to vector<2x8x32xf32>
    %21 = arith.mulf %19, %20 : vector<2x8x32xf32>
    %22 = arith.addf %16, %21 : vector<2x8x32xf32>
    %23 = vector.extract_strided_slice %1 {offsets = [0, 0, 3], sizes = [2, 8, 1], strides = [1, 1, 1]} : vector<2x8x8xf32> to vector<2x8x1xf32>
    %24 = vector.extract_strided_slice %5 {offsets = [0, 3, 0], sizes = [2, 1, 32], strides = [1, 1, 1]} : vector<2x8x32xf32> to vector<2x1x32xf32>
    %25 = vector.broadcast %23 : vector<2x8x1xf32> to vector<2x8x32xf32>
    %26 = vector.broadcast %24 : vector<2x1x32xf32> to vector<2x8x32xf32>
    %27 = arith.mulf %25, %26 : vector<2x8x32xf32>
    %28 = arith.addf %22, %27 : vector<2x8x32xf32>
    %29 = vector.extract_strided_slice %1 {offsets = [0, 0, 4], sizes = [2, 8, 1], strides = [1, 1, 1]} : vector<2x8x8xf32> to vector<2x8x1xf32>
    %30 = vector.extract_strided_slice %5 {offsets = [0, 4, 0], sizes = [2, 1, 32], strides = [1, 1, 1]} : vector<2x8x32xf32> to vector<2x1x32xf32>
    %31 = vector.broadcast %29 : vector<2x8x1xf32> to vector<2x8x32xf32>
    %32 = vector.broadcast %30 : vector<2x1x32xf32> to vector<2x8x32xf32>
    %33 = arith.mulf %31, %32 : vector<2x8x32xf32>
    %34 = arith.addf %28, %33 : vector<2x8x32xf32>
    %35 = vector.extract_strided_slice %1 {offsets = [0, 0, 5], sizes = [2, 8, 1], strides = [1, 1, 1]} : vector<2x8x8xf32> to vector<2x8x1xf32>
    %36 = vector.extract_strided_slice %5 {offsets = [0, 5, 0], sizes = [2, 1, 32], strides = [1, 1, 1]} : vector<2x8x32xf32> to vector<2x1x32xf32>
    %37 = vector.broadcast %35 : vector<2x8x1xf32> to vector<2x8x32xf32>
    %38 = vector.broadcast %36 : vector<2x1x32xf32> to vector<2x8x32xf32>
    %39 = arith.mulf %37, %38 : vector<2x8x32xf32>
    %40 = arith.addf %34, %39 : vector<2x8x32xf32>
    %41 = vector.extract_strided_slice %1 {offsets = [0, 0, 6], sizes = [2, 8, 1], strides = [1, 1, 1]} : vector<2x8x8xf32> to vector<2x8x1xf32>
    %42 = vector.extract_strided_slice %5 {offsets = [0, 6, 0], sizes = [2, 1, 32], strides = [1, 1, 1]} : vector<2x8x32xf32> to vector<2x1x32xf32>
    %43 = vector.broadcast %41 : vector<2x8x1xf32> to vector<2x8x32xf32>
    %44 = vector.broadcast %42 : vector<2x1x32xf32> to vector<2x8x32xf32>
    %45 = arith.mulf %43, %44 : vector<2x8x32xf32>
    %46 = arith.addf %40, %45 : vector<2x8x32xf32>
    %47 = vector.extract_strided_slice %1 {offsets = [0, 0, 7], sizes = [2, 8, 1], strides = [1, 1, 1]} : vector<2x8x8xf32> to vector<2x8x1xf32>
    %48 = vector.extract_strided_slice %5 {offsets = [0, 7, 0], sizes = [2, 1, 32], strides = [1, 1, 1]} : vector<2x8x32xf32> to vector<2x1x32xf32>
    %49 = vector.broadcast %47 : vector<2x8x1xf32> to vector<2x8x32xf32>
    %50 = vector.broadcast %48 : vector<2x1x32xf32> to vector<2x8x32xf32>
    %51 = arith.mulf %49, %50 : vector<2x8x32xf32>
    %52 = arith.addf %46, %51 : vector<2x8x32xf32>
    %c0_7 = arith.constant 0 : index
    %c0_8 = arith.constant 0 : index
    %53 = vector.load %arg5[%c0_7, %c0_8] : memref<1x32xf32, #tpu.memory_space<vmem>>, vector<1x32xf32>
    %54 = vector.shape_cast %53 : vector<1x32xf32> to vector<1x1x32xf32>
    %55 = vector.broadcast %54 : vector<1x1x32xf32> to vector<2x8x32xf32>
    %56 = arith.addf %52, %55 : vector<2x8x32xf32>
    %cst_9 = arith.constant 0.000000e+00 : f32
    %57 = vector.broadcast %cst_9 : f32 to vector<2x8x32xf32>
    %58 = arith.maximumf %56, %57 : vector<2x8x32xf32>
    %59 = vector.shape_cast %58 : vector<2x8x32xf32> to vector<16x32xf32>
    %c0_10 = arith.constant 0 : index
    %c0_11 = arith.constant 0 : index
    %60 = vector.load %arg6[%c0_10, %c0_11] : memref<32x16xf32, #tpu.memory_space<vmem>>, vector<32x16xf32>
    %cst_12 = arith.constant dense<0.000000e+00> : vector<16x16xf32>
    %61 = tpu.matmul %59, %60, %cst_12 {dimension_numbers = #tpu.dot_dimension_numbers<[1], [0], [0], [1], [0, 0, 1, 1], [], []>} : vector<16x32xf32>, vector<32x16xf32>, vector<16x16xf32> -> vector<16x16xf32>
    %62 = vector.shape_cast %61 : vector<16x16xf32> to vector<2x8x16xf32>
    %63 = vector.extract_strided_slice %1 {offsets = [0, 0, 0], sizes = [2, 8, 1], strides = [1, 1, 1]} : vector<2x8x8xf32> to vector<2x8x1xf32>
    %64 = vector.extract_strided_slice %62 {offsets = [0, 0, 0], sizes = [2, 1, 16], strides = [1, 1, 1]} : vector<2x8x16xf32> to vector<2x1x16xf32>
    %65 = vector.broadcast %63 : vector<2x8x1xf32> to vector<2x8x16xf32>
    %66 = vector.broadcast %64 : vector<2x1x16xf32> to vector<2x8x16xf32>
    %67 = arith.mulf %65, %66 : vector<2x8x16xf32>
    %68 = vector.extract_strided_slice %1 {offsets = [0, 0, 1], sizes = [2, 8, 1], strides = [1, 1, 1]} : vector<2x8x8xf32> to vector<2x8x1xf32>
    %69 = vector.extract_strided_slice %62 {offsets = [0, 1, 0], sizes = [2, 1, 16], strides = [1, 1, 1]} : vector<2x8x16xf32> to vector<2x1x16xf32>
    %70 = vector.broadcast %68 : vector<2x8x1xf32> to vector<2x8x16xf32>
    %71 = vector.broadcast %69 : vector<2x1x16xf32> to vector<2x8x16xf32>
    %72 = arith.mulf %70, %71 : vector<2x8x16xf32>
    %73 = arith.addf %67, %72 : vector<2x8x16xf32>
    %74 = vector.extract_strided_slice %1 {offsets = [0, 0, 2], sizes = [2, 8, 1], strides = [1, 1, 1]} : vector<2x8x8xf32> to vector<2x8x1xf32>
    %75 = vector.extract_strided_slice %62 {offsets = [0, 2, 0], sizes = [2, 1, 16], strides = [1, 1, 1]} : vector<2x8x16xf32> to vector<2x1x16xf32>
    %76 = vector.broadcast %74 : vector<2x8x1xf32> to vector<2x8x16xf32>
    %77 = vector.broadcast %75 : vector<2x1x16xf32> to vector<2x8x16xf32>
    %78 = arith.mulf %76, %77 : vector<2x8x16xf32>
    %79 = arith.addf %73, %78 : vector<2x8x16xf32>
    %80 = vector.extract_strided_slice %1 {offsets = [0, 0, 3], sizes = [2, 8, 1], strides = [1, 1, 1]} : vector<2x8x8xf32> to vector<2x8x1xf32>
    %81 = vector.extract_strided_slice %62 {offsets = [0, 3, 0], sizes = [2, 1, 16], strides = [1, 1, 1]} : vector<2x8x16xf32> to vector<2x1x16xf32>
    %82 = vector.broadcast %80 : vector<2x8x1xf32> to vector<2x8x16xf32>
    %83 = vector.broadcast %81 : vector<2x1x16xf32> to vector<2x8x16xf32>
    %84 = arith.mulf %82, %83 : vector<2x8x16xf32>
    %85 = arith.addf %79, %84 : vector<2x8x16xf32>
    %86 = vector.extract_strided_slice %1 {offsets = [0, 0, 4], sizes = [2, 8, 1], strides = [1, 1, 1]} : vector<2x8x8xf32> to vector<2x8x1xf32>
    %87 = vector.extract_strided_slice %62 {offsets = [0, 4, 0], sizes = [2, 1, 16], strides = [1, 1, 1]} : vector<2x8x16xf32> to vector<2x1x16xf32>
    %88 = vector.broadcast %86 : vector<2x8x1xf32> to vector<2x8x16xf32>
    %89 = vector.broadcast %87 : vector<2x1x16xf32> to vector<2x8x16xf32>
    %90 = arith.mulf %88, %89 : vector<2x8x16xf32>
    %91 = arith.addf %85, %90 : vector<2x8x16xf32>
    %92 = vector.extract_strided_slice %1 {offsets = [0, 0, 5], sizes = [2, 8, 1], strides = [1, 1, 1]} : vector<2x8x8xf32> to vector<2x8x1xf32>
    %93 = vector.extract_strided_slice %62 {offsets = [0, 5, 0], sizes = [2, 1, 16], strides = [1, 1, 1]} : vector<2x8x16xf32> to vector<2x1x16xf32>
    %94 = vector.broadcast %92 : vector<2x8x1xf32> to vector<2x8x16xf32>
    %95 = vector.broadcast %93 : vector<2x1x16xf32> to vector<2x8x16xf32>
    %96 = arith.mulf %94, %95 : vector<2x8x16xf32>
    %97 = arith.addf %91, %96 : vector<2x8x16xf32>
    %98 = vector.extract_strided_slice %1 {offsets = [0, 0, 6], sizes = [2, 8, 1], strides = [1, 1, 1]} : vector<2x8x8xf32> to vector<2x8x1xf32>
    %99 = vector.extract_strided_slice %62 {offsets = [0, 6, 0], sizes = [2, 1, 16], strides = [1, 1, 1]} : vector<2x8x16xf32> to vector<2x1x16xf32>
    %100 = vector.broadcast %98 : vector<2x8x1xf32> to vector<2x8x16xf32>
    %101 = vector.broadcast %99 : vector<2x1x16xf32> to vector<2x8x16xf32>
    %102 = arith.mulf %100, %101 : vector<2x8x16xf32>
    %103 = arith.addf %97, %102 : vector<2x8x16xf32>
    %104 = vector.extract_strided_slice %1 {offsets = [0, 0, 7], sizes = [2, 8, 1], strides = [1, 1, 1]} : vector<2x8x8xf32> to vector<2x8x1xf32>
    %105 = vector.extract_strided_slice %62 {offsets = [0, 7, 0], sizes = [2, 1, 16], strides = [1, 1, 1]} : vector<2x8x16xf32> to vector<2x1x16xf32>
    %106 = vector.broadcast %104 : vector<2x8x1xf32> to vector<2x8x16xf32>
    %107 = vector.broadcast %105 : vector<2x1x16xf32> to vector<2x8x16xf32>
    %108 = arith.mulf %106, %107 : vector<2x8x16xf32>
    %109 = arith.addf %103, %108 : vector<2x8x16xf32>
    %c0_13 = arith.constant 0 : index
    %c0_14 = arith.constant 0 : index
    %110 = vector.load %arg7[%c0_13, %c0_14] : memref<1x16xf32, #tpu.memory_space<vmem>>, vector<1x16xf32>
    %111 = vector.shape_cast %110 : vector<1x16xf32> to vector<1x1x16xf32>
    %112 = vector.broadcast %111 : vector<1x1x16xf32> to vector<2x8x16xf32>
    %113 = arith.addf %109, %112 : vector<2x8x16xf32>
    %cst_15 = arith.constant 0.000000e+00 : f32
    %114 = vector.broadcast %cst_15 : f32 to vector<2x8x16xf32>
    %115 = arith.maximumf %113, %114 : vector<2x8x16xf32>
    %c0_16 = arith.constant 0 : index
    %c0_17 = arith.constant 0 : index
    %116 = vector.load %arg3[%c0_16, %c0_17] : memref<2x1xi32, #tpu.memory_space<vmem>>, vector<2x1xi32>
    %117 = tpu.iota {dimensions = array<i32: 1>} : vector<2x8x1xi32>
    %118 = vector.shape_cast %116 : vector<2x1xi32> to vector<2x1x1xi32>
    %119 = vector.broadcast %118 : vector<2x1x1xi32> to vector<2x8x1xi32>
    %120 = arith.cmpi slt, %117, %119 : vector<2x8x1xi32>
    %121 = arith.extui %120 : vector<2x8x1xi1> to vector<2x8x1xi32>
    %122 = arith.sitofp %121 : vector<2x8x1xi32> to vector<2x8x1xf32>
    %123 = vector.broadcast %122 : vector<2x8x1xf32> to vector<2x8x16xf32>
    %124 = arith.mulf %115, %123 : vector<2x8x16xf32>
    %cst_18 = arith.constant dense<0.000000e+00> : vector<2x16xf32>
    %125 = vector.multi_reduction <add>, %124, %cst_18 [1] : vector<2x8x16xf32> to vector<2x16xf32>
    %c1_i32 = arith.constant 1 : i32
    %126 = vector.broadcast %c1_i32 : i32 to vector<2x1xi32>
    %127 = arith.maxsi %116, %126 : vector<2x1xi32>
    %128 = arith.sitofp %127 : vector<2x1xi32> to vector<2x1xf32>
    %129 = tpu.reciprocal %128 {approx = true} : vector<2x1xf32> -> vector<2x1xf32>
    %130 = vector.broadcast %129 : vector<2x1xf32> to vector<2x16xf32>
    %131 = arith.mulf %125, %130 : vector<2x16xf32>
    %c0_19 = arith.constant 0 : index
    %c0_20 = arith.constant 0 : index
    %132 = vector.load %arg8[%c0_19, %c0_20] : memref<1x16xf32, #tpu.memory_space<vmem>>, vector<1x16xf32>
    %133 = vector.broadcast %132 : vector<1x16xf32> to vector<2x16xf32>
    %134 = arith.mulf %131, %133 : vector<2x16xf32>
    %cst_21 = arith.constant dense<0.000000e+00> : vector<2xf32>
    %135 = vector.multi_reduction <add>, %134, %cst_21 [1] : vector<2x16xf32> to vector<2xf32>
    %136 = vector.shape_cast %135 : vector<2xf32> to vector<2x1xf32>
    %c0_22 = arith.constant 0 : index
    %c0_23 = arith.constant 0 : index
    %137 = vector.load %arg9[%c0_22, %c0_23] : memref<1x1xf32, #tpu.memory_space<vmem>>, vector<1x1xf32>
    %138 = vector.broadcast %137 : vector<1x1xf32> to vector<2x1xf32>
    %139 = arith.addf %136, %138 : vector<2x1xf32>
    %c0_24 = arith.constant 0 : index
    %c0_25 = arith.constant 0 : index
    %140 = vector.load %arg10[%c0_24, %c0_25] : memref<2x1xf32, #tpu.memory_space<vmem>>, vector<2x1xf32>
    tpu.vector_store %arg10[%c0_24, %c0_25], %139 {strides = array<i32>} : memref<2x1xf32, #tpu.memory_space<vmem>>, vector<2x1xf32>,
    return
  }
  func.func @transform_0(%arg0: i32) -> (i32, i32, i32) {
    %c0_i32 = arith.constant 0 : i32
    %c0_i32_0 = arith.constant 0 : i32
    %c0_i32_1 = arith.constant 0 : i32
    return %arg0, %c0_i32, %c0_i32_0 : i32, i32, i32
  }
  func.func @transform_1(%arg0: i32) -> (i32, i32, i32) {
    %c0_i32 = arith.constant 0 : i32
    %c0_i32_0 = arith.constant 0 : i32
    %c0_i32_1 = arith.constant 0 : i32
    return %arg0, %c0_i32, %c0_i32_0 : i32, i32, i32
  }
  func.func @transform_2(%arg0: i32) -> (i32, i32) {
    %c0_i32 = arith.constant 0 : i32
    %c0_i32_0 = arith.constant 0 : i32
    return %arg0, %c0_i32 : i32, i32
  }
  func.func @transform_3(%arg0: i32) -> (i32, i32) {
    %c0_i32 = arith.constant 0 : i32
    %c0_i32_0 = arith.constant 0 : i32
    %c0_i32_1 = arith.constant 0 : i32
    return %c0_i32, %c0_i32_0 : i32, i32
  }
  func.func @transform_4(%arg0: i32) -> (i32, i32) {
    %c0_i32 = arith.constant 0 : i32
    %c0_i32_0 = arith.constant 0 : i32
    %c0_i32_1 = arith.constant 0 : i32
    return %c0_i32, %c0_i32_0 : i32, i32
  }
  func.func @transform_5(%arg0: i32) -> (i32, i32) {
    %c0_i32 = arith.constant 0 : i32
    %c0_i32_0 = arith.constant 0 : i32
    %c0_i32_1 = arith.constant 0 : i32
    return %c0_i32, %c0_i32_0 : i32, i32
  }
  func.func @transform_6(%arg0: i32) -> (i32, i32) {
    %c0_i32 = arith.constant 0 : i32
    %c0_i32_0 = arith.constant 0 : i32
    %c0_i32_1 = arith.constant 0 : i32
    return %c0_i32, %c0_i32_0 : i32, i32
  }
  func.func @transform_7(%arg0: i32) -> (i32, i32) {
    %c0_i32 = arith.constant 0 : i32
    %c0_i32_0 = arith.constant 0 : i32
    %c0_i32_1 = arith.constant 0 : i32
    return %c0_i32, %c0_i32_0 : i32, i32
  }
  func.func @transform_8(%arg0: i32) -> (i32, i32) {
    %c0_i32 = arith.constant 0 : i32
    %c0_i32_0 = arith.constant 0 : i32
    %c0_i32_1 = arith.constant 0 : i32
    return %c0_i32, %c0_i32_0 : i32, i32
  }
  func.func @transform_9(%arg0: i32) -> (i32, i32) {
    %c0_i32 = arith.constant 0 : i32
    %c0_i32_0 = arith.constant 0 : i32
    return %arg0, %c0_i32 : i32, i32
  }
}

</mosaic_0001>

<bundles_post_ra>
// kernel: tpu_custom_call.1
= control target key start
LH: loop header
LB: loop body
LE: loop exit
PB: predicated region body
PF: predicated region fallthrough
CT: control target
= control target key end

     0   :  { %vm40_vm0 = vcmask 130048   ;;  %v673_v3 = vmov 0   ;;  %v674_v8 = vmov 1   ;;  %v675_v9 = vmov 2   ;;  %s899_s3 = inlined_call_operand.vmem [shape: f32[16,32], index: 3, kind: input, shape index: {}]   ;;  %s900_s0 = inlined_call_operand.vmem [shape: f32[2,8,16], index: 0, kind: input, shape index: {}]   ;;  %s901_s1 = inlined_call_operand.vmem [shape: f32[2,8,8], index: 1, kind: input, shape index: {}]   ;;  %s902_s5 = inlined_call_operand.vmem [shape: f32[32,16], index: 5, kind: input, shape index: {}]   ;;  %s903_s2 = inlined_call_operand.vmem [shape: s32[2,1], index: 2, kind: input, shape index: {}]   ;;  %s904_s4 = inlined_call_operand.vmem [shape: f32[1,32], index: 4, kind: input, shape index: {}]   ;;  %s905_s8 = inlined_call_operand.<no memory space> [shape: f32[1,1], index: 8, kind: input, shape index: {}]   ;;  %s906_s6 = inlined_call_operand.vmem [shape: f32[1,16], index: 6, kind: input, shape index: {}]   ;;  %s907_s7 = inlined_call_operand.vmem [shape: f32[1,16], index: 7, kind: input, shape index: {}]   ;;  %s908_s9 = inlined_call_operand.vmem [shape: f32[2,1], index: 9, kind: output, shape index: {}]  }
   0x1   :  { %v38_v0 = vld [vmem:[%s899_s3] sm:$0xff]  ;;  %v39_v1 = vld [vmem:[%s899_s3 + $0x8] sm:$0xff]  ;;  %657 = vset.pattern.permute.xlu1 %v673_v3  ;;  %655 = vset.pattern.permute.xlu0 %v673_v3  ;;  %v676_v10 = vmov 3   ;;  %v677_v11 = vmov 4   ;;  %v678_v12 = vmov 5   ;;  %v679_v13 = vmov 7  }
   0x2   :  { %v34_v2 = vld [vmem:[%s900_s0] sm:$0xff]  ;;  %v633_v4 = vpack.c.bf16 %v39_v1, %v38_v0  ;;  %v37_v5 = vld [vmem:[%s901_s1 + $0x8] sm:$0xff]  ;;  %v680_v14 = vmov 6   ;;  %v295_v17 = vld [vmem:[%s902_s5 + $0x10] sm:$0xff]  ;;  %v132_v21 = vlaneseq  ;;  %v681_v23 = vmov 1966171168  }
   0x3   :  { %619 = vmatprep.mubr.msk.f32.mxu0 %vm40_vm0, %v34_v2  ;;  %v36_v6 = vld [vmem:[%s901_s1] sm:$0xff]  ;;  %129 = vperm.xlu1 %657, %v37_v5   ;;  %v35_v7 = vld [vmem:[%s900_s0 + $0x8] sm:$0xff]  ;;  %v296_v19 = vld [vmem:[%s902_s5 + $0x18] sm:$0xff]  ;;  %v488_v24 = vunpack.c.l.s4 %v681_v23  ;;  %v682_v37 = vmov 0.0   ;;  %vm297_vm4 = vcmask 261120   ;;  %vm574_vm5 = vcmask 1041409  }
   0x4   :  { %124 = vperm.xlu0 %655, %v36_v6   ;;  %634 = vmatprep.subr.bf16.mxu0 %v633_v4  ;;  %v293_v15 = vld [vmem:[%s902_s5] sm:$0xff]  ;;  %v294_v16 = vld [vmem:[%s902_s5 + $0x8] sm:$0xff]  ;;  %v641_v20 = vpack.c.bf16 %v296_v19, %v295_v17  ;;  %v133_v25 = vshrl.u32 %v132_v21, 7  ;;  %vm577_vm6 = vcmask 123904   ;;  %vm589_vm7 = vcmask 1024  }
   0x5   :  { %636 = vmatpush3.bf16.msra.mxu0 %v633_v4  ;;  %v637_v18 = vpack.c.bf16 %v294_v16, %v293_v15  ;;  %v484_v22 = vld [vmem:[%s903_s2] sm:$0x3]  ;;  %v489_v26 = vunpack.c.0.s8 %v488_v24 }
   0x6   :  { %vm549_vm1 = vcmp.gt.s32.totalorder %v484_v22, 1  ;;  %v768_v31 = vsub.s32 0, %v133_v25  ;;  %v792_v51 = vsub.s32 1, %v133_v25  ;;  %v794_v52 = vsub.s32 2, %v133_v25 }
   0x7   :  { %658 = vset.pattern.permute.xlu1 %v674_v8  ;;  %638 = vmatprep.subr.bf16.mxu1 %v637_v18  ;;  %v550_v27 = vsel %vm549_vm1, %v484_v22, 1  ;;  %v492_v29 = vsub.s32 %v489_v26, %v133_v25  ;;  %v796_v53 = vsub.s32 3, %v133_v25  ;;  %v802_v58 = vsub.s32 4, %v133_v25 }
   0x8   :  { %656 = vset.pattern.permute.xlu0 %v674_v8  ;;  %620 = vmatmul.mubr.msk.f32.vlgmr.msra.gmra.mrb[0].mxu0 %vm40_vm0, %v35_v7  ;;  %v551_v28 = vcvt.s32.f32 %v550_v27  ;;  %v810_v1 = vsub.s32 5, %v133_v25  ;;  %v818_v8 = vsub.s32 6, %v133_v25 }
   0x9   :  { %147 = vperm.xlu1 %658, %v37_v5   ;;  %143 = vperm.xlu0 %656, %v36_v6   ;;  %v493_v30 = vrot.slane %v484_v22, %v492_v29 }
   0xa   :  { %640 = vmatpush3.bf16.msra.mxu1 %v637_v18  ;;  %671 = vrcp.f32 %v551_v28 }
   0xb   :  { %642 = vmatprep.subr.bf16.mxu1 %v641_v20  ;;  %v494_v32 = vcombine.high %v493_v30, %v493_v30  ;;  %v501_v33 = vrot.slane %v493_v30, %v492_v29 }
   0xd   :  { %659 = vset.pattern.permute.xlu1 %v675_v9  ;;  %660 = vset.pattern.permute.xlu0 %v675_v9  ;;  %v508_v34 = vrot.slane %v494_v32, %v492_v29  ;;  %v512_v35 = vrot.slane %v501_v33, %v768_v31 }
   0xe   :  { %163 = vperm.xlu1 %659, %v36_v6   ;;  %167 = vperm.xlu0 %660, %v37_v5  }
   0xf   :  { %644 = vmatpush3.bf16.msra.mxu1 %v641_v20  ;;  %v516_v36 = vrot.slane %v508_v34, %v768_v31  ;;  %vm517_vm2 = vcmp.lt.s32.totalorder %v133_v25, %v512_v35 }
  0x10   :  { %v601_v38 = vsel %vm517_vm2, 1.0, %v682_v37 }
  0x11   :  { %vm518_vm3 = vcmp.lt.s32.totalorder %v133_v25, %v516_v36 }
  0x12   :  { %661 = vset.pattern.permute.xlu1 %v676_v10  ;;  %662 = vset.pattern.permute.xlu0 %v677_v11  ;;  %v602_v39 = vsel %vm518_vm3, 1.0, %v682_v37 }
  0x13   :  { %183 = vperm.xlu1 %661, %v36_v6   ;;  %203 = vperm.xlu0 %662, %v36_v6  }
  0x14   :  { %v672_v40 = vpop.eup %671 }
  0x17   :  { %187 = vperm.xlu1 %661, %v37_v5   ;;  %665 = vset.pattern.permute.xlu0 %v678_v12 }
  0x18   :  { %227 = vperm.xlu0 %665, %v37_v5  }
  0x1b   :  { %663 = vset.pattern.permute.xlu1 %v677_v11 }
  0x1c   :  { %207 = vperm.xlu1 %663, %v37_v5   ;;  %667 = vset.pattern.permute.xlu0 %v679_v13 }
  0x1d   :  { %263 = vperm.xlu0 %667, %v36_v6  }
  0x20   :  { %664 = vset.pattern.permute.xlu1 %v678_v12 }
  0x21   :  { %223 = vperm.xlu1 %664, %v36_v6   ;;  %670 = vset.pattern.permute.xlu0 %v673_v3 }
  0x22   :  { %525 = vperm.xlu0 %670, %v601_v38  }
  0x25   :  { %666 = vset.pattern.permute.xlu1 %v680_v14 }
  0x26   :  { %243 = vperm.xlu1 %666, %v36_v6  }
  0x2a   :  { %247 = vperm.xlu1 %666, %v37_v5  }
  0x2e   :  { %668 = vset.pattern.permute.xlu1 %v679_v13  ;;  %v824_v13 = vsub.s32 7, %v133_v25 }
  0x2f   :  { %267 = vperm.xlu1 %668, %v37_v5  }
  0x33   :  { %669 = vset.pattern.permute.xlu1 %v673_v3 }
  0x34   :  { %530 = vperm.xlu1 %669, %v602_v39  }
  0x38   :  { %555 = vperm.xlu1 %669, %v672_v40  }
  0x82   :  { %v772_v41 = vpop.permute.xlu1 %129 }
  0x83   :  { %v782_v46 = vpop.permute.xlu0 %124 }
  0x88   :  { %v774_v42 = vpop.permute.xlu1 %147  ;;  %v786_v48 = vpop.permute.xlu0 %143 }
  0x8d   :  { %v776_v43 = vpop.permute.xlu1 %163  ;;  %v790_v50 = vpop.permute.xlu0 %167 }
  0x92   :  { %v778_v44 = vpop.permute.xlu1 %183  ;;  %v800_v56 = vpop.permute.xlu0 %203 }
  0x96   :  { %v780_v45 = vpop.permute.xlu1 %187 }
  0x97   :  { %v827_v16 = vpop.permute.xlu0 %227 }
  0x9b   :  { %v784_v47 = vpop.permute.xlu1 %207 }
  0x9c   :  { %v845_v40 = vpop.permute.xlu0 %263 }
  0xa0   :  { %v788_v49 = vpop.permute.xlu1 %223 }
  0xa5   :  { %v798_v54 = vpop.permute.xlu1 %243 }
  0xa9   :  { %v822_v12 = vpop.permute.xlu1 %247 }
  0xae   :  { %v840_v34 = vpop.permute.xlu1 %267 }
  0xdb   :  { %v621_v55 = vpop.f32.mrb[0].mxu0 }
  0xdc   :  { %v113_v57 = vpop.f32.mrb[1].mxu0  ;;  %v139_v59 = vrot.slane %v621_v55, %v768_v31  ;;  %v157_v60 = vrot.slane %v621_v55, %v792_v51  ;;  %v177_v61 = vrot.slane %v621_v55, %v794_v52  ;;  %v197_v4 = vrot.slane %v621_v55, %v796_v53 }
  0xdd   :  { %v135_v62 = vrot.slane %v113_v57, %v768_v31  ;;  %v153_v63 = vrot.slane %v113_v57, %v792_v51  ;;  %v173_v0 = vrot.slane %v113_v57, %v794_v52  ;;  %v193_v7 = vrot.slane %v113_v57, %v796_v53 }
  0xde   :  { %v141_v2 = vmul.f32 %v139_v59, %v772_v41  ;;  %v159_v3 = vmul.f32 %v157_v60, %v774_v42  ;;  %v179_v10 = vmul.f32 %v177_v61, %v790_v50  ;;  %v217_v11 = vrot.slane %v621_v55, %v802_v58 }
  0xdf   :  { %v140_v5 = vmul.f32 %v135_v62, %v782_v46  ;;  %v158_v6 = vmul.f32 %v153_v63, %v786_v48  ;;  %v178_v15 = vmul.f32 %v173_v0, %v776_v43  ;;  %v199_v18 = vmul.f32 %v197_v4, %v780_v45  ;;  %v597_v0 = vld [vmem:[%s904_s4] ss:$0 sm:$0xff] }
  0xe0   :  { %v161_v9 = vadd.f32 %v159_v3, %v141_v2  ;;  %v237_v19 = vrot.slane %v621_v55, %v810_v1  ;;  %v213_v20 = vrot.slane %v113_v57, %v802_v58  ;;  %v198_v22 = vmul.f32 %v193_v7, %v778_v44 }
  0xe1   :  { %v160_v14 = vadd.f32 %v158_v6, %v140_v5  ;;  %v233_v23 = vrot.slane %v113_v57, %v810_v1  ;;  %v219_v25 = vmul.f32 %v217_v11, %v784_v47  ;;  %v257_v26 = vrot.slane %v621_v55, %v818_v8 }
  0xe2   :  { %v181_v17 = vadd.f32 %v179_v10, %v161_v9  ;;  %v218_v28 = vmul.f32 %v213_v20, %v800_v56  ;;  %v253_v29 = vrot.slane %v113_v57, %v818_v8  ;;  %v239_v32 = vmul.f32 %v237_v19, %v827_v16 }
  0xe3   :  { %v180_v21 = vadd.f32 %v178_v15, %v160_v14  ;;  %v277_v33 = vrot.slane %v621_v55, %v824_v13  ;;  %v238_v36 = vmul.f32 %v233_v23, %v788_v49  ;;  %v273_v37 = vrot.slane %v113_v57, %v824_v13 }
  0xe4   :  { %v201_v24 = vadd.f32 %v199_v18, %v181_v17  ;;  %v259_v39 = vmul.f32 %v257_v26, %v822_v12  ;;  %v258_v60 = vmul.f32 %v253_v29, %v798_v54  ;;  %v14_v7 = vstv %s905_s8 }
  0xe5   :  { %v200_v27 = vadd.f32 %v198_v22, %v180_v21  ;;  %v279_v62 = vmul.f32 %v277_v33, %v840_v34  ;;  %v278_v55 = vmul.f32 %v273_v37, %v845_v40  ;;  %15 = vst [vmem:[#allocation2] sm:$0x1] %v14_v7 }
  0xe6   :  { %v221_v30 = vadd.f32 %v219_v25, %v201_v24 }
  0xe7   :  { %v220_v35 = vadd.f32 %v218_v28, %v200_v27 }
  0xe8   :  { %v241_v38 = vadd.f32 %v239_v32, %v221_v30 }
  0xe9   :  { %v240_v59 = vadd.f32 %v238_v36, %v220_v35 }
  0xea   :  { %v261_v61 = vadd.f32 %v259_v39, %v241_v38 }
  0xeb   :  { %v260_v63 = vadd.f32 %v258_v60, %v240_v59 }
  0xec   :  { %v281_v2 = vadd.f32 %v279_v62, %v261_v61 }
  0xed   :  { %v280_v57 = vadd.f32 %v278_v55, %v260_v63 }
  0xee   :  { %v290_v3 = vadd.f32 %v597_v0, %v281_v2 }
  0xef   :  { %v289_v4 = vadd.f32 %v597_v0, %v280_v57  ;;  %v526_v0 = vpop.permute.xlu0 %525 }
  0xf0   :  { %v292_v6 = vmax.f32 %v290_v3, 0.0 }
  0xf1   :  { %v291_v5 = vmax.f32 %v289_v4, 0.0 }
  0xf3   :  { %630 = vmatprep.mubr.msk.f32.mxu1 %vm297_vm4, %v291_v5 }
  0xf4   :  { %631 = vmatmul.mubr.msk.f32.vlgmr.msra.gmra.mrb[0].mxu1 %vm297_vm4, %v292_v6 }
 0x1c7   :  { %v632_v9 = vpop.f32.mrb[0].mxu1 }
 0x1c8   :  { %v386_v10 = vrot.slane %v632_v9, %v768_v31  ;;  %v396_v11 = vrot.slane %v632_v9, %v792_v51  ;;  %v370_v14 = vpop.f32.mrb[1].mxu1  ;;  %v408_v15 = vrot.slane %v632_v9, %v794_v52  ;;  %v420_v22 = vrot.slane %v632_v9, %v796_v53 }
 0x1c9   :  { %v382_v17 = vrot.slane %v370_v14, %v768_v31  ;;  %v392_v18 = vrot.slane %v370_v14, %v792_v51  ;;  %v404_v19 = vrot.slane %v370_v14, %v794_v52  ;;  %v416_v25 = vrot.slane %v370_v14, %v796_v53 }
 0x1ca   :  { %v388_v20 = vmul.f32 %v386_v10, %v772_v41  ;;  %v398_v21 = vmul.f32 %v396_v11, %v774_v42  ;;  %v410_v27 = vmul.f32 %v408_v15, %v790_v50  ;;  %v432_v31 = vrot.slane %v632_v9, %v802_v58 }
 0x1cb   :  { %v387_v23 = vmul.f32 %v382_v17, %v782_v46  ;;  %v397_v24 = vmul.f32 %v392_v18, %v786_v48  ;;  %v409_v52 = vmul.f32 %v404_v19, %v776_v43  ;;  %v422_v41 = vmul.f32 %v420_v22, %v780_v45 }
 0x1cc   :  { %v400_v26 = vadd.f32 %v398_v21, %v388_v20  ;;  %v444_v42 = vrot.slane %v632_v9, %v810_v1  ;;  %v428_v29 = vrot.slane %v370_v14, %v802_v58  ;;  %v421_v48 = vmul.f32 %v416_v25, %v778_v44  ;;  %v603_v20 = vld [vmem:[%s907_s7] ss:$0 sm:$0xff] }
 0x1cd   :  { %v399_v51 = vadd.f32 %v397_v24, %v387_v23  ;;  %v440_v53 = vrot.slane %v370_v14, %v810_v1  ;;  %v434_v50 = vmul.f32 %v432_v31, %v784_v47  ;;  %v456_v32 = vrot.slane %v632_v9, %v818_v8 }
 0x1ce   :  { %v412_v28 = vadd.f32 %v410_v27, %v400_v26  ;;  %v433_v43 = vmul.f32 %v428_v29, %v800_v56  ;;  %v452_v35 = vrot.slane %v370_v14, %v818_v8  ;;  %v446_v36 = vmul.f32 %v444_v42, %v827_v16  ;;  %v600_v8 = vld [vmem:[%s906_s6] ss:$0 sm:$0xff] }
 0x1cf   :  { %v411_v46 = vadd.f32 %v409_v52, %v399_v51  ;;  %v468_v58 = vrot.slane %v632_v9, %v824_v13  ;;  %v445_v44 = vmul.f32 %v440_v53, %v788_v49  ;;  %v464_v1 = vrot.slane %v370_v14, %v824_v13  ;;  %v604_v51 = vld [vmem:[#allocation2] ss:$0 sm:$0xff] }
 0x1d0   :  { %v424_v30 = vadd.f32 %v422_v41, %v412_v28  ;;  %v458_v47 = vmul.f32 %v456_v32, %v822_v12  ;;  %v457_v59 = vmul.f32 %v452_v35, %v798_v54  ;;  %v531_v12 = vpop.permute.xlu1 %530 }
 0x1d1   :  { %v423_v33 = vadd.f32 %v421_v48, %v411_v46  ;;  %v470_v56 = vmul.f32 %v468_v58, %v840_v34  ;;  %v469_v61 = vmul.f32 %v464_v1, %v845_v40 }
 0x1d2   :  { %v436_v45 = vadd.f32 %v434_v50, %v424_v30 }
 0x1d3   :  { %v435_v37 = vadd.f32 %v433_v43, %v423_v33 }
 0x1d4   :  { %v448_v38 = vadd.f32 %v446_v36, %v436_v45  ;;  %v556_v11 = vpop.permute.xlu1 %555 }
 0x1d5   :  { %v447_v39 = vadd.f32 %v445_v44, %v435_v37  ;;  %v557_v19 = vrot.slane %v556_v11, 1 }
 0x1d6   :  { %v460_v60 = vadd.f32 %v458_v47, %v448_v38 }
 0x1d7   :  { %v459_v16 = vadd.f32 %v457_v59, %v447_v39 }
 0x1d8   :  { %v472_v62 = vadd.f32 %v470_v56, %v460_v60 }
 0x1d9   :  { %v471_v49 = vadd.f32 %v469_v61, %v459_v16 }
 0x1da   :  { %v481_v63 = vadd.f32 %v600_v8, %v472_v62 }
 0x1db   :  { %v480_v13 = vadd.f32 %v600_v8, %v471_v49 }
 0x1dc   :  { %v483_v55 = vmax.f32 %v481_v63, 0.0 }
 0x1dd   :  { %v482_v2 = vmax.f32 %v480_v13, 0.0 }
 0x1de   :  { %v534_v57 = vmul.f32 %v531_v12, %v483_v55 }
 0x1df   :  { %v533_v54 = vmul.f32 %v526_v0, %v482_v2 }
 0x1e0   :  { %v542_v3 = vsel %vm40_vm0, %v534_v57, 0.0 }
 0x1e1   :  { %v543_v34 = vrot.slane %v542_v3, 4  ;;  %v535_v4 = vsel %vm40_vm0, %v533_v54, 0.0 }
 0x1e2   :  { %v536_v5 = vrot.slane %v535_v4, 4 }
 0x1e3   :  { %v544_v6 = vadd.f32 %v543_v34, %v542_v3 }
 0x1e4   :  { %v537_v7 = vadd.f32 %v536_v5, %v535_v4 }
 0x1e5   :  { %v545_v9 = vrot.slane %v544_v6, 2 }
 0x1e6   :  { %v538_v40 = vrot.slane %v537_v7, 2 }
 0x1e7   :  { %v546_v10 = vadd.f32 %v545_v9, %v544_v6 }
 0x1e8   :  { %v539_v14 = vadd.f32 %v538_v40, %v537_v7 }
 0x1e9   :  { %v547_v15 = vrot.slane %v546_v10, 1 }
 0x1ea   :  { %v540_v17 = vrot.slane %v539_v14, 1 }
 0x1eb   :  { %v548_v18 = vadd.f32 %v547_v15, %v546_v10 }
 0x1ec   :  { %v541_v21 = vadd.f32 %v540_v17, %v539_v14 }
 0x1ed   :  { %v561_v22 = vmul.f32 %v557_v19, %v548_v18 }
 0x1ee   :  { %v560_v23 = vmul.f32 %v556_v11, %v541_v21 }
 0x1ef   :  { %v570_v24 = vmul.f32 %v603_v20, %v561_v22 }
 0x1f0   :  { %v569_v25 = vmul.f32 %v603_v20, %v560_v23 }
 0x1f1   :  { %v573_v26 = vrot.slane %v570_v24, 7 }
 0x1f3   :  { %v575_v27 = vsel %vm574_vm5, %v573_v26, %v569_v25 }
 0x1f4   :  { %v578_v31 = vsel %vm577_vm6, %v575_v27, 0.0 }
 0x1f5   :  { %579 = vadd.xlane.f32.xlu1 %v578_v31 }
 0x282   :  { %v580_v52 = vpop.xlane.xlu1 %579 }
 0x283   :  { %v588_v28 = vadd.f32 %v604_v51, %v580_v52 }
 0x285   :  { %590 = vst.msk [vmem:[%s908_s9] sm:$0x3] %vm589_vm7, %v588_v28 }

</bundles_post_ra>
